<compile_context>
chip_gen: v7x
topology: tpu7x:2x2x1
jax: 0.10.0
libtpu: 0.0.40
codegen_flags: <defaults>
</compile_context>

<pallas_src>
import jax
import jax.numpy as jnp
from jax.experimental import pallas as pl
from jax.experimental.pallas import tpu as pltpu

_LANES = 128


# ---------------------------------------------------------------------------
# Hardware-aware limits
# ---------------------------------------------------------------------------


def _vmem_limit_bytes():
    """3/4 of physical VMEM: 48 MiB on v7x (64 MiB/core), 96 MiB on v5e/v6e."""
    cap = 64 * 1024 * 1024                   # conservative fallback (v7x per-core)
    try:
        cap = int(getattr(pltpu.get_tpu_info(), "vmem_capacity_bytes", cap))
    except Exception:                        # no TPU visible / interpret mode
        pass
    return int(min(max(cap * 3 // 4, 32 * 1024 * 1024), 112 * 1024 * 1024))


_VMEM_LIMIT = _vmem_limit_bytes()


def _round_up(x, m):
    return ((x + m - 1) // m) * m


# ---------------------------------------------------------------------------
# Kernel
# ---------------------------------------------------------------------------


def _softmax_over_batch(h):
    """Softmax over axis 0 (the batch axis), matching PyTorch's dim-less
    nn.Softmax on a 3-D input. Axis 0 is a leading (non-lane) axis, so the
    reductions are cheap elementwise work; exp goes to the EUP and the
    reciprocal is routed to the EUP slot via pl.reciprocal(approx=True)."""
    m = jnp.max(h, axis=0, keepdims=True)
    e = jnp.exp(h - m)
    den = jnp.sum(e, axis=0, keepdims=True)
    return e * pl.reciprocal(den, approx=True)


def _disc_kernel(x_ref, w1_ref, w2_ref, w3_ref, o_ref):
    # x_ref : (B, tile_s, 1)    f32   (lane-padded VMEM block)
    # w1_ref: (1, d_pad)        f32   Linear(1, d) weight row, zero-padded
    # w2_ref: (d_pad, d2_pad)   bf16  Linear(d, 2d), zero-padded
    # w3_ref: (d2_pad, 128)     bf16  Linear(2d, 2), padded to 128 lanes
    # o_ref : (B, tile_s, 128)  f32   lane-dense output block
    #
    # Biases are dropped: they are constant along the batch axis and cancel
    # exactly in the batch-axis softmax that follows every Linear.
    # TODO(synk): the batch-axis softmax needs all of B resident in one tile;
    # very large B would need an online two-pass batch softmax (B as an
    # 'arbitrary' grid axis with running max/sum accumulators).
    B, ts, _ = x_ref.shape
    d_pad = w1_ref.shape[1]
    d2_pad = w2_ref.shape[1]
    n_out = w3_ref.shape[1]

    w1 = w1_ref[...].reshape(1, 1, d_pad)
    x = x_ref[...]                                            # (B, ts, 1) f32

    # Layer 1: Linear(1, d). in_features == 1 -> pure VPU broadcast multiply.
    h = x * w1                                                # (B, ts, d_pad) f32
    h = _softmax_over_batch(h)

    # Layer 2: Linear(d, 2d). One fused (B*ts, d_pad) x (d_pad, d2_pad) bf16
    # matmul with f32 accumulation; ts is a multiple of 8 so the reshape only
    # merges leading dims (layout no-op). Zero-padded rows/cols contribute 0.
    h = jnp.dot(h.reshape(B * ts, d_pad).astype(jnp.bfloat16), w2_ref[...],
                preferred_element_type=jnp.float32)           # (B*ts, d2_pad) f32
    h = _softmax_over_batch(h.reshape(B, ts, d2_pad))

    # Layer 3: Linear(2d, 2), output padded to 128 lanes so the MXU pass and
    # the final store are full-lane (no masked vst.msk partial stores).
    h = jnp.dot(h.reshape(B * ts, d2_pad).astype(jnp.bfloat16), w3_ref[...],
                preferred_element_type=jnp.float32)           # (B*ts, 128) f32
    h = _softmax_over_batch(h.reshape(B, ts, n_out))

    # One contiguous, lane-dense block store per grid step.
    o_ref[...] = h


# ---------------------------------------------------------------------------
# Wrapper
# ---------------------------------------------------------------------------


def _resident_spec(shape):
    """BlockSpec for a grid-invariant operand: constant index_map (the pipeline
    keeps it VMEM-resident, no re-DMA) and — where the JAX version supports
    pipeline_mode — a single buffer instead of pointless double-buffering."""
    index_map = lambda i: (0,) * len(shape)
    try:
        return pl.BlockSpec(shape, index_map, pipeline_mode=pl.Buffered(1))
    except (TypeError, AttributeError):
        return pl.BlockSpec(shape, index_map)


def _auto_tile_s(B, S, d_pad, d2_pad, vmem_limit):
    """Largest sequence tile that fits an honest VMEM budget:
      * single-buffered weights,
      * double-buffered, lane-padded input (B,tile_s,1 -> 128 lanes) and output
        (B,tile_s,128) blocks,
      * ~4 live f32 copies of the widest activation (B,tile_s,d2_pad) plus 2 of
        the layer-1 activation (B,tile_s,d_pad),
    capped so the S grid keeps >= 4 steps whenever each step would still have
    >= 128 rows (keeps both v7x TensorCores busy and the pipeline fed)."""
    bytes_per_row = B * 4 * (
        2 * _LANES          # input block, lane-padded, double-buffered
        + 2 * _LANES        # output block, double-buffered
        + 4 * d2_pad        # live f32 copies of the widest activation
        + 2 * d_pad)        # layer-1 activation copies
    weight_bytes = d_pad * d2_pad * 2 + d2_pad * _LANES * 2 + 8 * d_pad * 4
    headroom = 4 * 1024 * 1024                       # compiler internal scratch
    budget = vmem_limit - weight_bytes - headroom
    cap = max(8, (budget // bytes_per_row) // 8 * 8)
    tile_s = min(cap, _round_up(S, 8))
    four_steps = _round_up(pl.cdiv(S, 4), 8)
    if four_steps >= 128:                            # only when steps stay chunky
        tile_s = min(tile_s, four_steps)
    return int(max(8, tile_s))


def discriminator_apply(spread, params, *, tile_s=None):
    """Jit-friendly forward: spread (B, S, 1) -> full prediction (B*S, 2).
    (No dynamic-shape mask filtering here, so this wrapper can be jitted.)"""
    B, S, one = spread.shape
    assert one == 1, "spread must have trailing feature dim of 1"
    w1, _b1, w2, _b2, w3, _b3 = params        # biases cancel in the batch softmax
    d_model = w1.shape[1]
    d_ff = w2.shape[1]                        # = 2 * d_model

    d_pad = _round_up(d_model, _LANES)
    d2_pad = _round_up(d_ff, _LANES)

    if tile_s is None:
        tile_s = _auto_tile_s(B, S, d_pad, d2_pad, _VMEM_LIMIT)
    tile_s = max(8, (int(tile_s) // 8) * 8)           # multiple of 8 sublanes
    tile_s = min(tile_s, _round_up(S, 8))
    s_pad = _round_up(S, tile_s)                      # pad so tiles divide S
    grid = (s_pad // tile_s,)

    x = spread.astype(jnp.float32)
    if s_pad != S:
        x = jnp.pad(x, ((0, 0), (0, s_pad - S), (0, 0)))
    # NOTE: the (B, tile_s, 1) block is lane-padded 128x in VMEM (accounted for
    # in _auto_tile_s); for extremely large tiles a dense (B, tile_s) slab +
    # in-kernel relayout would avoid the strided DMA, not needed at these sizes.

    # Zero-pad feature dims to 128-lane multiples (padded rows/cols are exactly
    # zero so they contribute nothing to the real outputs); matmul weights go
    # to bf16 for the MXU, w1 stays f32 (VPU broadcast path).
    w1p = jnp.zeros((1, d_pad), jnp.float32).at[:, :d_model].set(w1)
    w2p = jnp.zeros((d_pad, d2_pad), jnp.bfloat16).at[:d_model, :d_ff].set(
        w2.astype(jnp.bfloat16))
    w3p = jnp.zeros((d2_pad, _LANES), jnp.bfloat16).at[:d_ff, :2].set(
        w3.astype(jnp.bfloat16))

    out = pl.pallas_call(
        _disc_kernel,
        out_shape=jax.ShapeDtypeStruct((B, s_pad, _LANES), jnp.float32),
        grid_spec=pltpu.PrefetchScalarGridSpec(
            num_scalar_prefetch=0,
            grid=grid,
            in_specs=[
                pl.BlockSpec((B, tile_s, 1), lambda i: (0, i, 0)),
                _resident_spec((1, d_pad)),
                _resident_spec((d_pad, d2_pad)),
                _resident_spec((d2_pad, _LANES)),
            ],
            out_specs=pl.BlockSpec((B, tile_s, _LANES), lambda i: (0, i, 0)),
        ),
        compiler_params=pltpu.CompilerParams(
            dimension_semantics=("parallel",),   # S tiles independent; 2 TCs on v7x
            vmem_limit_bytes=_VMEM_LIMIT,
        ),
    )(x, w1p, w2p, w3p)

    if s_pad != S:
        out = out[:, :S, :]
    return out[:, :, :2].reshape(B * S, 2)


_apply_jit = jax.jit(discriminator_apply, static_argnames=("tile_s",))


def discriminator_forward(spread, mask, params, *, filter_rows=True):
    """Full module forward matching PyTorch: returns (pred, ignore_index).
    The dynamic-shape row filter is kept OUT of the jitted hot path; pass
    filter_rows=False to get the dense (B*S, 2) prediction plus ignore_index
    and let the consumer apply the mask."""
    pred = _apply_jit(spread, params)
    if mask is None:
        return pred, None
    ignore_index = mask[:, :, 0].reshape(-1)
    if filter_rows:
        # TODO(synk): torch's pred[ignore_index.bool()] is a dynamic-shape boolean
        # row filter with no Pallas/jit equivalent; applied eagerly here (host sync).
        keep = jnp.nonzero(ignore_index.astype(bool))[0]
        pred = pred[keep]
    return pred, ignore_index


# ---------------------------------------------------------------------------
# Params & reference
# ---------------------------------------------------------------------------


def init_params(key, d_model):
    """Deterministic parameter init. Weights stored as (in, out) (transposed
    relative to PyTorch's (out, in))."""
    ks = jax.random.split(key, 6)
    scale = 0.1
    w1 = scale * jax.random.normal(ks[0], (1, d_model), jnp.float32)
    b1 = scale * jax.random.normal(ks[1], (1, d_model), jnp.float32)
    w2 = scale * jax.random.normal(ks[2], (d_model, 2 * d_model), jnp.float32)
    b2 = scale * jax.random.normal(ks[3], (1, 2 * d_model), jnp.float32)
    w3 = scale * jax.random.normal(ks[4], (2 * d_model, 2), jnp.float32)
    b3 = scale * jax.random.normal(ks[5], (1, 2), jnp.float32)
    return (w1, b1, w2, b2, w3, b3)


def _reference_forward_full(spread, params, *, bf16_matmul):
    """Pure-JAX reference reproducing the PyTorch semantics (softmax over dim 0,
    with biases). With bf16_matmul=True it matches the kernel's matmul dtype."""
    w1, b1, w2, b2, w3, b3 = params

    def mm(a, w):
        if bf16_matmul:
            return jnp.matmul(a.astype(jnp.bfloat16), w.astype(jnp.bfloat16),
                              preferred_element_type=jnp.float32)
        return jnp.matmul(a, w)

    h = spread.astype(jnp.float32) * w1[0] + b1[0]      # Linear(1, d)
    h = jax.nn.softmax(h, axis=0)
    h = mm(h, w2) + b2[0]
    h = jax.nn.softmax(h, axis=0)
    h = mm(h, w3) + b3[0]
    h = jax.nn.softmax(h, axis=0)
    return h.reshape(-1, 2)


# ---------------------------------------------------------------------------
# Demo / self-test
# ---------------------------------------------------------------------------


if __name__ == "__main__":
    B, S, F = 2, 8, 4
    d_model = 32   # padded to 128 lanes inside the wrapper

    key = jax.random.PRNGKey(0)
    k_spread, k_params, k_spread2 = jax.random.split(key, 3)

    spread = jax.random.normal(k_spread, (B, S, 1), jnp.float32)
    keep_flag = (jnp.arange(B * S) % 3 != 0).astype(jnp.float32).reshape(B, S, 1)
    mask = jnp.concatenate([keep_flag, jnp.ones((B, S, F - 1), jnp.float32)],
                           axis=-1)

    params = init_params(k_params, d_model)

    # --- main path: masked forward (PyTorch semantics) ---
    pred, ignore_index = discriminator_forward(spread, mask, params)
    pred = jax.block_until_ready(pred)

    keep = jnp.nonzero(mask[:, :, 0].reshape(-1).astype(bool))[0]
    ref_matched = _reference_forward_full(spread, params, bf16_matmul=True)
    ref_f32 = _reference_forward_full(spread, params, bf16_matmul=False)

    assert pred.shape == (int(keep.shape[0]), 2), pred.shape
    assert jnp.allclose(pred, ref_matched[keep], atol=5e-3, rtol=5e-3), \
        "mismatch vs precision-matched reference"
    assert jnp.allclose(pred, ref_f32[keep], atol=3e-2, rtol=3e-2), \
        "mismatch vs f32 reference"

    # --- hot-path (unfiltered) and mask=None paths ---
    pred_dense, ig = discriminator_forward(spread, mask, params, filter_rows=False)
    jax.block_until_ready(pred_dense)
    assert pred_dense.shape == (B * S, 2) and ig is not None
    pred_all, ig_none = discriminator_forward(spread, None, params)
    jax.block_until_ready(pred_all)
    assert pred_all.shape == (B * S, 2) and ig_none is None

    # --- gridded + padded sequence path (forces multiple S tiles) ---
    B2, S2 = 4, 70
    spread2 = jax.random.normal(k_spread2, (B2, S2, 1), jnp.float32)
    pred2 = _apply_jit(spread2, params, tile_s=16)      # grid of 5 tiles, pad 70->80
    pred2 = jax.block_until_ready(pred2)
    ref2 = _reference_forward_full(spread2, params, bf16_matmul=True)
    assert pred2.shape == (B2 * S2, 2), pred2.shape
    assert jnp.allclose(pred2, ref2, atol=5e-3, rtol=5e-3), \
        "mismatch on gridded/padded path"

    print("KERNEL_OK")
</pallas_src>

<mosaic_0001>
module attributes {stable_mosaic.version = 11 : i64} {
  func.func @_disc_kernel(%arg0: i32, %arg1: memref<2x8x1xf32, #tpu.memory_space<vmem>>, %arg2: memref<1x128xf32, #tpu.memory_space<vmem>>, %arg3: memref<128x128xbf16, #tpu.memory_space<vmem>>, %arg4: memref<128x128xbf16, #tpu.memory_space<vmem>>, %arg5: memref<2x8x128xf32, #tpu.memory_space<vmem>>) attributes {dimension_semantics = [#tpu.dimension_semantics<parallel>], iteration_bounds = array<i64: 1>, scalar_prefetch = 0 : i64, scratch_operands = 0 : i64, tpu.core_type = #tpu.core_type<tc>, window_params = [{transform_indices = @transform_0, window_bounds = array<i64: 2, 8, 1>}, {pipeline_mode = #tpu.pipeline_mode<synchronous>, transform_indices = @transform_1, window_bounds = array<i64: 1, 128>}, {pipeline_mode = #tpu.pipeline_mode<synchronous>, transform_indices = @transform_2, window_bounds = array<i64: 128, 128>}, {pipeline_mode = #tpu.pipeline_mode<synchronous>, transform_indices = @transform_3, window_bounds = array<i64: 128, 128>}, {transform_indices = @transform_4, window_bounds = array<i64: 2, 8, 128>}]} {
    %c0 = arith.constant 0 : index
    %c0_0 = arith.constant 0 : index
    %0 = vector.load %arg2[%c0, %c0_0] : memref<1x128xf32, #tpu.memory_space<vmem>>, vector<1x128xf32>
    %1 = vector.shape_cast %0 : vector<1x128xf32> to vector<1x1x128xf32>
    %c0_1 = arith.constant 0 : index
    %c0_2 = arith.constant 0 : index
    %c0_3 = arith.constant 0 : index
    %2 = vector.load %arg1[%c0_1, %c0_2, %c0_3] : memref<2x8x1xf32, #tpu.memory_space<vmem>>, vector<2x8x1xf32>
    %3 = vector.broadcast %2 : vector<2x8x1xf32> to vector<2x8x128xf32>
    %4 = vector.broadcast %1 : vector<1x1x128xf32> to vector<2x8x128xf32>
    %5 = arith.mulf %3, %4 : vector<2x8x128xf32>
    %cst = arith.constant dense<0xFF800000> : vector<8x128xf32>
    %6 = vector.multi_reduction <maximumf>, %5, %cst [0] : vector<2x8x128xf32> to vector<8x128xf32>
    %7 = vector.shape_cast %6 : vector<8x128xf32> to vector<1x8x128xf32>
    %8 = vector.broadcast %7 : vector<1x8x128xf32> to vector<2x8x128xf32>
    %9 = arith.subf %5, %8 : vector<2x8x128xf32>
    %10 = math.exp %9 : vector<2x8x128xf32>
    %cst_4 = arith.constant dense<0.000000e+00> : vector<8x128xf32>
    %11 = vector.multi_reduction <add>, %10, %cst_4 [0] : vector<2x8x128xf32> to vector<8x128xf32>
    %12 = vector.shape_cast %11 : vector<8x128xf32> to vector<1x8x128xf32>
    %13 = tpu.reciprocal %12 {approx = true} : vector<1x8x128xf32> -> vector<1x8x128xf32>
    %14 = vector.broadcast %13 : vector<1x8x128xf32> to vector<2x8x128xf32>
    %15 = arith.mulf %10, %14 : vector<2x8x128xf32>
    %16 = vector.shape_cast %15 : vector<2x8x128xf32> to vector<16x128xf32>
    %17 = arith.truncf %16 : vector<16x128xf32> to vector<16x128xbf16>
    %c0_5 = arith.constant 0 : index
    %c0_6 = arith.constant 0 : index
    %18 = vector.load %arg3[%c0_5, %c0_6] : memref<128x128xbf16, #tpu.memory_space<vmem>>, vector<128x128xbf16>
    %cst_7 = arith.constant dense<0.000000e+00> : vector<16x128xf32>
    %19 = tpu.matmul %17, %18, %cst_7 {dimension_numbers = #tpu.dot_dimension_numbers<[1], [0], [0], [1], [0, 0, 1, 1], [], []>} : vector<16x128xbf16>, vector<128x128xbf16>, vector<16x128xf32> -> vector<16x128xf32>
    %20 = vector.shape_cast %19 : vector<16x128xf32> to vector<2x8x128xf32>
    %cst_8 = arith.constant dense<0xFF800000> : vector<8x128xf32>
    %21 = vector.multi_reduction <maximumf>, %20, %cst_8 [0] : vector<2x8x128xf32> to vector<8x128xf32>
    %22 = vector.shape_cast %21 : vector<8x128xf32> to vector<1x8x128xf32>
    %23 = vector.broadcast %22 : vector<1x8x128xf32> to vector<2x8x128xf32>
    %24 = arith.subf %20, %23 : vector<2x8x128xf32>
    %25 = math.exp %24 : vector<2x8x128xf32>
    %cst_9 = arith.constant dense<0.000000e+00> : vector<8x128xf32>
    %26 = vector.multi_reduction <add>, %25, %cst_9 [0] : vector<2x8x128xf32> to vector<8x128xf32>
    %27 = vector.shape_cast %26 : vector<8x128xf32> to vector<1x8x128xf32>
    %28 = tpu.reciprocal %27 {approx = true} : vector<1x8x128xf32> -> vector<1x8x128xf32>
    %29 = vector.broadcast %28 : vector<1x8x128xf32> to vector<2x8x128xf32>
    %30 = arith.mulf %25, %29 : vector<2x8x128xf32>
    %31 = vector.shape_cast %30 : vector<2x8x128xf32> to vector<16x128xf32>
    %32 = arith.truncf %31 : vector<16x128xf32> to vector<16x128xbf16>
    %c0_10 = arith.constant 0 : index
    %c0_11 = arith.constant 0 : index
    %33 = vector.load %arg4[%c0_10, %c0_11] : memref<128x128xbf16, #tpu.memory_space<vmem>>, vector<128x128xbf16>
    %cst_12 = arith.constant dense<0.000000e+00> : vector<16x128xf32>
    %34 = tpu.matmul %32, %33, %cst_12 {dimension_numbers = #tpu.dot_dimension_numbers<[1], [0], [0], [1], [0, 0, 1, 1], [], []>} : vector<16x128xbf16>, vector<128x128xbf16>, vector<16x128xf32> -> vector<16x128xf32>
    %35 = vector.shape_cast %34 : vector<16x128xf32> to vector<2x8x128xf32>
    %cst_13 = arith.constant dense<0xFF800000> : vector<8x128xf32>
    %36 = vector.multi_reduction <maximumf>, %35, %cst_13 [0] : vector<2x8x128xf32> to vector<8x128xf32>
    %37 = vector.shape_cast %36 : vector<8x128xf32> to vector<1x8x128xf32>
    %38 = vector.broadcast %37 : vector<1x8x128xf32> to vector<2x8x128xf32>
    %39 = arith.subf %35, %38 : vector<2x8x128xf32>
    %40 = math.exp %39 : vector<2x8x128xf32>
    %cst_14 = arith.constant dense<0.000000e+00> : vector<8x128xf32>
    %41 = vector.multi_reduction <add>, %40, %cst_14 [0] : vector<2x8x128xf32> to vector<8x128xf32>
    %42 = vector.shape_cast %41 : vector<8x128xf32> to vector<1x8x128xf32>
    %43 = tpu.reciprocal %42 {approx = true} : vector<1x8x128xf32> -> vector<1x8x128xf32>
    %44 = vector.broadcast %43 : vector<1x8x128xf32> to vector<2x8x128xf32>
    %45 = arith.mulf %40, %44 : vector<2x8x128xf32>
    %c0_15 = arith.constant 0 : index
    %c0_16 = arith.constant 0 : index
    %c0_17 = arith.constant 0 : index
    %46 = vector.load %arg5[%c0_15, %c0_16, %c0_17] : memref<2x8x128xf32, #tpu.memory_space<vmem>>, vector<2x8x128xf32>
    tpu.vector_store %arg5[%c0_15, %c0_16, %c0_17], %45 {strides = array<i32>} : memref<2x8x128xf32, #tpu.memory_space<vmem>>, vector<2x8x128xf32>,
    return
  }
  func.func @transform_0(%arg0: i32) -> (i32, i32, i32) {
    %c0_i32 = arith.constant 0 : i32
    %c0_i32_0 = arith.constant 0 : i32
    %c0_i32_1 = arith.constant 0 : i32
    return %c0_i32, %arg0, %c0_i32_0 : i32, i32, i32
  }
  func.func @transform_1(%arg0: i32) -> (i32, i32) {
    %c0_i32 = arith.constant 0 : i32
    %c0_i32_0 = arith.constant 0 : i32
    %c0_i32_1 = arith.constant 0 : i32
    return %c0_i32, %c0_i32_0 : i32, i32
  }
  func.func @transform_2(%arg0: i32) -> (i32, i32) {
    %c0_i32 = arith.constant 0 : i32
    %c0_i32_0 = arith.constant 0 : i32
    %c0_i32_1 = arith.constant 0 : i32
    return %c0_i32, %c0_i32_0 : i32, i32
  }
  func.func @transform_3(%arg0: i32) -> (i32, i32) {
    %c0_i32 = arith.constant 0 : i32
    %c0_i32_0 = arith.constant 0 : i32
    %c0_i32_1 = arith.constant 0 : i32
    return %c0_i32, %c0_i32_0 : i32, i32
  }
  func.func @transform_4(%arg0: i32) -> (i32, i32, i32) {
    %c0_i32 = arith.constant 0 : i32
    %c0_i32_0 = arith.constant 0 : i32
    %c0_i32_1 = arith.constant 0 : i32
    return %c0_i32, %arg0, %c0_i32_0 : i32, i32, i32
  }
}

</mosaic_0001>

<bundles_post_ra>
// kernel: discriminator_apply.1
= control target key start
LH: loop header
LB: loop body
LE: loop exit
PB: predicated region body
PF: predicated region fallthrough
CT: control target
= control target key end

     0   :  { %v403_v0 = vmov 0   ;;  %v404_v4 = vmov 0.0   ;;  %vm405_vm0 = vmmov 0   ;;  %s512_s0 = inlined_call_operand.vmem [shape: f32[2,8,1], index: 0, kind: input, shape index: {}]   ;;  %s513_s2 = inlined_call_operand.vmem [shape: bf16[128,128], index: 2, kind: input, shape index: {}]   ;;  %s514_s1 = inlined_call_operand.vmem [shape: f32[1,128], index: 1, kind: input, shape index: {}]   ;;  %s515_s3 = inlined_call_operand.vmem [shape: bf16[128,128], index: 3, kind: input, shape index: {}]   ;;  %s516_s4 = inlined_call_operand.vmem [shape: f32[2,8,128], index: 4, kind: output, shape index: {}]  }
   0x1   :  { %368 = vset.pattern.permute.xlu0 %v403_v0  ;;  %v19_v1 = vld [vmem:[%s512_s0] sm:$0xff]  ;;  %v20_v2 = vld [vmem:[%s512_s0 + $0x8] sm:$0xff]  ;;  %325 = vmatprep.subr.bf16.mxu0 %v404_v4  ;;  %v371_v6 = vld [vmem:[%s513_s2 + $0x10] sm:$0xff]  }
   0x2   :  { %23 = vperm.xlu0 %368, %v19_v1   ;;  %v369_v3 = vld [vmem:[%s513_s2] sm:$0xff]   ;;  %345 = vmatprep.subr.bf16.mxu1 %v404_v4  ;;  %v370_v5 = vld [vmem:[%s513_s2 + $0x8] sm:$0xff]   ;;  %v372_v7 = vld [vmem:[%s513_s2 + $0x18] sm:$0xff]  }
   0x3   :  { %326 = vmatpush3.bf16.msra.mxu0 %v369_v3  ;;  %v373_v8 = vld [vmem:[%s513_s2 + $0x20] sm:$0xff]   ;;  %v374_v9 = vld [vmem:[%s513_s2 + $0x28] sm:$0xff]   ;;  %341 = vmatprep.mubr.msk.bf16.mxu0 %vm405_vm0, %v404_v4  ;;  %v375_v10 = vld [vmem:[%s513_s2 + $0x30] sm:$0xff]  }
   0x4   :  { %327 = vmatprep.subr.bf16.mxu0 %v404_v4  ;;  %361 = vmatprep.mubr.msk.bf16.mxu1 %vm405_vm0, %v404_v4  ;;  %v376_v11 = vld [vmem:[%s513_s2 + $0x38] sm:$0xff]   ;;  %v290_v13 = vld [vmem:[%s514_s1] ss:$0 sm:$0xff]  ;;  %v378_v30 = vld [vmem:[%s515_s3 + $0x8] sm:$0xff]  }
   0x5   :  { %v377_v29 = vld [vmem:[%s515_s3] sm:$0xff]   ;;  %v379_v31 = vld [vmem:[%s515_s3 + $0x10] sm:$0xff]   ;;  %v380_v32 = vld [vmem:[%s515_s3 + $0x18] sm:$0xff]  }
   0x6   :  { %28 = vperm.xlu0 %368, %v20_v2   ;;  %346 = vmatpush3.bf16.msra.mxu1 %v377_v29  ;;  %v381_v33 = vld [vmem:[%s515_s3 + $0x20] sm:$0xff]   ;;  %v382_v34 = vld [vmem:[%s515_s3 + $0x28] sm:$0xff]   ;;  %v383_v35 = vld [vmem:[%s515_s3 + $0x30] sm:$0xff]  }
   0x7   :  { %328 = vmatpush3.bf16.msra.mxu0 %v370_v5  ;;  %347 = vmatprep.subr.bf16.mxu1 %v404_v4  ;;  %v384_v36 = vld [vmem:[%s515_s3 + $0x38] sm:$0xff]  }
   0x8   :  { %329 = vmatprep.subr.bf16.mxu0 %v404_v4 }
   0xa   :  { %348 = vmatpush3.bf16.msra.mxu1 %v378_v30 }
   0xb   :  { %330 = vmatpush3.bf16.msra.mxu0 %v371_v6  ;;  %349 = vmatprep.subr.bf16.mxu1 %v404_v4 }
   0xc   :  { %331 = vmatprep.subr.bf16.mxu0 %v404_v4 }
   0xe   :  { %350 = vmatpush3.bf16.msra.mxu1 %v379_v31 }
   0xf   :  { %332 = vmatpush3.bf16.msra.mxu0 %v372_v7  ;;  %351 = vmatprep.subr.bf16.mxu1 %v404_v4 }
  0x10   :  { %333 = vmatprep.subr.bf16.mxu0 %v404_v4 }
  0x12   :  { %352 = vmatpush3.bf16.msra.mxu1 %v380_v32 }
  0x13   :  { %334 = vmatpush3.bf16.msra.mxu0 %v373_v8  ;;  %353 = vmatprep.subr.bf16.mxu1 %v404_v4 }
  0x14   :  { %335 = vmatprep.subr.bf16.mxu0 %v404_v4 }
  0x16   :  { %354 = vmatpush3.bf16.msra.mxu1 %v381_v33 }
  0x17   :  { %336 = vmatpush3.bf16.msra.mxu0 %v374_v9  ;;  %355 = vmatprep.subr.bf16.mxu1 %v404_v4 }
  0x18   :  { %337 = vmatprep.subr.bf16.mxu0 %v404_v4 }
  0x1a   :  { %356 = vmatpush3.bf16.msra.mxu1 %v382_v34 }
  0x1b   :  { %338 = vmatpush3.bf16.msra.mxu0 %v375_v10  ;;  %357 = vmatprep.subr.bf16.mxu1 %v404_v4 }
  0x1c   :  { %339 = vmatprep.subr.bf16.mxu0 %v404_v4 }
  0x1e   :  { %358 = vmatpush3.bf16.msra.mxu1 %v383_v35 }
  0x1f   :  { %340 = vmatpush3.bf16.msra.mxu0 %v376_v11  ;;  %359 = vmatprep.subr.bf16.mxu1 %v404_v4 }
  0x22   :  { %360 = vmatpush3.bf16.msra.mxu1 %v384_v36 }
  0x81   :  { %v24_v12 = vpop.permute.xlu0 %23 }
  0x82   :  { %v37_v15 = vmul.f32 %v290_v13, %v24_v12 }
  0x85   :  { %v29_v14 = vpop.permute.xlu0 %28 }
  0x86   :  { %v38_v16 = vmul.f32 %v290_v13, %v29_v14 }
  0x88   :  { %v39_v17 = vmax.f32 %v37_v15, %v38_v16 }
  0x8a   :  { %v40_v18 = vsub.f32 %v37_v15, %v39_v17  ;;  %v41_v19 = vsub.f32 %v38_v16, %v39_v17 }
  0x8c   :  { %v42_v20 = vmul.f32 1.442695, %v40_v18  ;;  %v44_v21 = vmul.f32 1.442695, %v41_v19 }
  0x8e   :  { %385 = vpow2.f32 %v42_v20 }
  0x8f   :  { %387 = vpow2.f32 %v44_v21 }
  0x98   :  { %v386_v22 = vpop.eup %385 }
  0x99   :  { %v388_v23 = vpop.eup %387 }
  0x9a   :  { %v46_v24 = vadd.f32 %v388_v23, %v386_v22 }
  0x9c   :  { %389 = vrcp.f32 %v46_v24 }
  0xa6   :  { %v390_v25 = vpop.eup %389 }
  0xa7   :  { %v48_v26 = vmul.f32 %v390_v25, %v386_v22  ;;  %v49_v27 = vmul.f32 %v390_v25, %v388_v23 }
  0xa9   :  { %v50_v28 = vpack.c.bf16 %v49_v27, %v48_v26 }
  0xab   :  { %342 = vmatmul.mubr.bf16.vlgmr.msra.gmra.mrb[0].mxu0 %v50_v28 }
 0x17e   :  { %v149_v37 = vpop.f32.mrb[0].mxu0 }
 0x17f   :  { %v343_v38 = vpop.f32.mrb[1].mxu0 }
 0x180   :  { %v152_v39 = vpop.f32.mrb[2].mxu0 }
 0x181   :  { %v156_v40 = vmax.f32 %v149_v37, %v152_v39  ;;  %v344_v41 = vpop.f32.mrb[3].mxu0 }
 0x183   :  { %v157_v42 = vsub.f32 %v149_v37, %v156_v40  ;;  %v158_v43 = vsub.f32 %v152_v39, %v156_v40 }
 0x185   :  { %v159_v44 = vmul.f32 1.442695, %v157_v42  ;;  %v161_v45 = vmul.f32 1.442695, %v158_v43 }
 0x187   :  { %391 = vpow2.f32 %v159_v44 }
 0x188   :  { %393 = vpow2.f32 %v161_v45 }
 0x191   :  { %v392_v46 = vpop.eup %391 }
 0x192   :  { %v394_v47 = vpop.eup %393 }
 0x193   :  { %v163_v48 = vadd.f32 %v394_v47, %v392_v46 }
 0x195   :  { %395 = vrcp.f32 %v163_v48 }
 0x19f   :  { %v396_v49 = vpop.eup %395 }
 0x1a0   :  { %v165_v50 = vmul.f32 %v396_v49, %v392_v46  ;;  %v166_v51 = vmul.f32 %v396_v49, %v394_v47 }
 0x1a2   :  { %v167_v52 = vpack.c.bf16 %v166_v51, %v165_v50 }
 0x1a4   :  { %362 = vmatmul.mubr.bf16.vlgmr.msra.gmra.mrb[0].mxu1 %v167_v52 }
 0x277   :  { %v266_v53 = vpop.f32.mrb[0].mxu1 }
 0x278   :  { %v363_v54 = vpop.f32.mrb[1].mxu1 }
 0x279   :  { %v269_v55 = vpop.f32.mrb[2].mxu1 }
 0x27a   :  { %v273_v56 = vmax.f32 %v266_v53, %v269_v55  ;;  %v364_v57 = vpop.f32.mrb[3].mxu1 }
 0x27c   :  { %v274_v58 = vsub.f32 %v266_v53, %v273_v56  ;;  %v275_v59 = vsub.f32 %v269_v55, %v273_v56 }
 0x27e   :  { %v276_v60 = vmul.f32 1.442695, %v274_v58  ;;  %v278_v61 = vmul.f32 1.442695, %v275_v59 }
 0x280   :  { %397 = vpow2.f32 %v276_v60 }
 0x281   :  { %399 = vpow2.f32 %v278_v61 }
 0x28a   :  { %v398_v62 = vpop.eup %397 }
 0x28b   :  { %v400_v63 = vpop.eup %399 }
 0x28c   :  { %v280_v0 = vadd.f32 %v400_v63, %v398_v62 }
 0x28e   :  { %401 = vrcp.f32 %v280_v0 }
 0x298   :  { %v402_v1 = vpop.eup %401 }
 0x299   :  { %v282_v2 = vmul.f32 %v402_v1, %v398_v62  ;;  %v283_v3 = vmul.f32 %v402_v1, %v400_v63 }
 0x29b   :  { %284 = vst [vmem:[%s516_s4] sm:$0xff] %v282_v2  ;;  %285 = vst [vmem:[%s516_s4 + $0x8] sm:$0xff] %v283_v3 }

</bundles_post_ra>
